<compile_context>
chip_gen: v7x
topology: tpu7x:2x2x1
jax: 0.10.0
libtpu: 0.0.40
codegen_flags: <defaults>
</compile_context>

<pallas_src>
import jax
import jax.numpy as jnp
from jax import lax
from jax.experimental import pallas as pl
from jax.experimental.pallas import tpu as pltpu

BN_EPS = 1e-5  # nn.BatchNorm2d default eps


# -----------------------------------------------------------------------------
# VMEM budgeting / tiling helpers
# -----------------------------------------------------------------------------
def _vmem_capacity_bytes():
    try:
        return int(pltpu.get_tpu_info().vmem_capacity_bytes)
    except Exception:
        return 64 * 1024 * 1024  # conservative default (v7x per-TC VMEM)


_VMEM_CAP = _vmem_capacity_bytes()
_VMEM_LIMIT = min(48 * 1024 * 1024, (_VMEM_CAP * 3) // 4)
_DATA_VMEM_BUDGET = _VMEM_LIMIT // 4        # double-buffered data blocks budget


def _round_up(x, m):
    return ((x + m - 1) // m) * m


def _pick_hw_tile(hw, bytes_per_col):
    """Largest lane-dense (multiple-of-128) divisor of HW under the VMEM budget."""
    cap = max(128, _DATA_VMEM_BUDGET // max(bytes_per_col, 1))
    best = 0
    t = 128
    while t <= min(hw, cap):
        if hw % t == 0:
            best = t
        t += 128
    if best:
        return best
    # HW < 128 or not a multiple of 128: single full-extent tile (still correct).
    # TODO(synk): pl.cdiv grid with a lane-masked last tile for large ragged HW.
    return hw


# -----------------------------------------------------------------------------
# In-kernel math helpers
# -----------------------------------------------------------------------------
def _silu(y):
    # y * sigmoid(y); exp and the approximate reciprocal both run on the EUP.
    return y * pl.reciprocal(1.0 + jnp.exp(-y), approx=True)


# -----------------------------------------------------------------------------
# Kernel 1: fused (multi-input, split-output) 1x1 conv + BN + SiLU
# -----------------------------------------------------------------------------
def _make_pointwise_kernel(num_inputs, out_splits):
    """refs = (x_0..x_{k-1}, w_0..w_{k-1}, bias, out_0..out_{m-1}).

    Per (batch, hw-tile) grid step:
        x_i : (C_in_i, HW_t)   w_i : (C_out, C_in_i)   bias : (C_out, 1) f32
    Computes  y = silu(sum_i w_i @ x_i + bias)  and writes channel splits of y
    to the outputs.
    """

    def kernel(*refs):
        xs = refs[:num_inputs]
        ws = refs[num_inputs:2 * num_inputs]
        b_ref = refs[2 * num_inputs]
        outs = refs[2 * num_inputs + 1:]

        acc = b_ref[...]                                      # (C_out, 1) f32
        for x_ref, w_ref in zip(xs, ws):
            acc = acc + jnp.dot(w_ref[...], x_ref[...],
                                preferred_element_type=jnp.float32)
        y = _silu(acc)
        off = 0
        for o_ref, size in zip(outs, out_splits):
            o_ref[...] = y[off:off + size].astype(o_ref.dtype)
            off += size

    return kernel


def fused_pointwise(xs, ws, b, out_splits=None, out_dtype=None):
    """silu(sum_i w_i @ x_i + b), batched over N, lane-dense tiled over HW.

    xs[i]: (N, C_in_i, HW)   ws[i]: (C_out, C_in_i)   b: (C_out,) f32
    out_splits: channel sizes of the outputs (sum == C_out).
    """
    assert len(xs) == len(ws) >= 1
    n, _, hw = xs[0].shape
    c_out = ws[0].shape[0]
    if out_dtype is None:
        out_dtype = xs[0].dtype
    if out_splits is None:
        out_splits = (c_out,)
    out_splits = tuple(int(s) for s in out_splits)
    assert sum(out_splits) == c_out

    bytes_per_col = (sum(2 * x.shape[1] * x.dtype.itemsize for x in xs)
                     + sum(2 * s * jnp.dtype(out_dtype).itemsize
                           for s in out_splits))
    hw_t = _pick_hw_tile(hw, bytes_per_col)
    grid = (n, hw // hw_t)

    data_map = lambda i, j: (i, 0, j)   # batch-squeezed, HW-tiled blocks
    const_map = lambda i, j: (0, 0)     # weights / bias stay resident in VMEM

    in_specs, args = [], []
    for x, w in zip(xs, ws):
        assert x.shape == (n, w.shape[1], hw) and w.shape[0] == c_out
        in_specs.append(pl.BlockSpec((None, x.shape[1], hw_t), data_map))
        args.append(x)
    for w in ws:
        in_specs.append(pl.BlockSpec(w.shape, const_map))
        args.append(w)
    in_specs.append(pl.BlockSpec((c_out, 1), const_map))
    args.append(jnp.asarray(b, jnp.float32).reshape(c_out, 1))

    out_specs = tuple(pl.BlockSpec((None, s, hw_t), data_map) for s in out_splits)
    out_shape = tuple(jax.ShapeDtypeStruct((n, s, hw), out_dtype)
                      for s in out_splits)
    single = len(out_splits) == 1

    return pl.pallas_call(
        _make_pointwise_kernel(len(xs), out_splits),
        out_shape=out_shape[0] if single else out_shape,
        grid=grid,
        in_specs=in_specs,
        out_specs=out_specs[0] if single else out_specs,
        compiler_params=pltpu.CompilerParams(
            dimension_semantics=("parallel", "parallel"),
            vmem_limit_bytes=_VMEM_LIMIT),
    )(*args)


# -----------------------------------------------------------------------------
# Kernel 2: fused Bottleneck  (1x1+BN+SiLU  ->  3x3+BN+SiLU  -> residual add)
# -----------------------------------------------------------------------------
def _make_bottleneck_kernel(h, w, pad, add):
    hw = h * w

    def kernel(x_ref, w1_ref, b1_ref, w2_ref, b2_ref, cmask_ref, out_ref, t_scr):
        x = x_ref[...]                                        # (C, HW)

        # ---- 1x1 conv + folded BN + SiLU (f32 accumulation) ----
        t = jnp.dot(w1_ref[...], x, preferred_element_type=jnp.float32)
        t = _silu(t + b1_ref[...])                            # (C, HW) f32

        # ---- stage t into a zero-padded flat scratch (implicit row halo) ----
        zeros = jnp.zeros((x.shape[0], pad), t_scr.dtype)
        t_scr[:, :pad] = zeros
        t_scr[:, pad + hw:] = zeros
        t_scr[:, pad:pad + hw] = t.astype(t_scr.dtype)

        def tap(oy, ox):                                      # t[p + oy*W + ox]
            start = pad + oy * w + ox
            return t_scr[:, start:start + hw]

        def col_sum(ox):                                      # sum over ky
            acc = None
            for oy in (-1, 0, 1):
                k = (oy + 1) * 3 + (ox + 1)                   # ky*3 + kx
                d = jnp.dot(w2_ref[k], tap(oy, ox),
                            preferred_element_type=jnp.float32)
                acc = d if acc is None else acc + d
            return acc

        # ---- 3x3 conv: row halo handled by the zero padding of the flat
        #      scratch; only the two column offsets need a border mask. ----
        y = col_sum(0) + b2_ref[...]
        y = y + col_sum(-1) * cmask_ref[0]                    # left taps valid: col >= 1
        y = y + col_sum(1) * cmask_ref[1]                     # right taps valid: col <= W-2
        y = _silu(y)
        if add:
            y = y + x.astype(jnp.float32)                     # residual (f32)
        out_ref[...] = y.astype(out_ref.dtype)

    return kernel


def fused_bottleneck(x, w1, b1, w2_taps, b2, cmask, h, w, add):
    """x: (N, C, HW) -> (N, C, HW); one grid step per batch image."""
    n, c, hw = x.shape
    pad = _round_up(w + 1, 128)                 # lane-aligned flat halo
    kernel = _make_bottleneck_kernel(h, w, pad, bool(add))

    data_map = lambda i: (i, 0, 0)
    const2 = lambda i: (0, 0)
    const3 = lambda i: (0, 0, 0)

    return pl.pallas_call(
        kernel,
        out_shape=jax.ShapeDtypeStruct((n, c, hw), x.dtype),
        grid=(n,),
        in_specs=[
            pl.BlockSpec((None, c, hw), data_map),            # cur
            pl.BlockSpec((c, c), const2),                     # w1 (1x1)
            pl.BlockSpec((c, 1), const2),                     # b1
            pl.BlockSpec((9, c, c), const3),                  # w2 taps (3x3)
            pl.BlockSpec((c, 1), const2),                     # b2
            pl.BlockSpec((2, 1, hw), const3),                 # column border masks
        ],
        out_specs=pl.BlockSpec((None, c, hw), data_map),
        scratch_shapes=[pltpu.VMEM((c, hw + 2 * pad), x.dtype)],
        compiler_params=pltpu.CompilerParams(
            dimension_semantics=("parallel",),
            vmem_limit_bytes=_VMEM_LIMIT),
    )(x, w1, jnp.asarray(b1, jnp.float32).reshape(c, 1),
      w2_taps, jnp.asarray(b2, jnp.float32).reshape(c, 1), cmask)


# -----------------------------------------------------------------------------
# Wrapper-side helpers (pure XLA glue: BN folding, weight layout, masks)
# -----------------------------------------------------------------------------
def _fold_bn(w, gamma, beta, mean, var, eps=BN_EPS):
    scale = gamma / jnp.sqrt(var + eps)
    return w * scale[:, None, None, None], beta - mean * scale


def _folded_1x1(conv):
    w_f, b_f = _fold_bn(conv["w"], conv["gamma"], conv["beta"],
                        conv["mean"], conv["var"])
    return w_f[:, :, 0, 0], b_f                       # (C_out, C_in), (C_out,)


def _folded_3x3_taps(conv):
    w_f, b_f = _fold_bn(conv["w"], conv["gamma"], conv["beta"],
                        conv["mean"], conv["var"])
    c_out, c_in = w_f.shape[:2]
    # tap index k = ky*3 + kx, matching the kernel's (oy+1)*3 + (ox+1) lookup
    w_taps = jnp.transpose(w_f, (2, 3, 0, 1)).reshape(9, c_out, c_in)
    return w_taps, b_f


def _border_cmasks(h, w):
    col = jnp.arange(h * w, dtype=jnp.int32) % w
    left_ok = (col >= 1)                     # valid output columns for ox = -1
    right_ok = (col <= w - 2)                # valid output columns for ox = +1
    return jnp.stack([left_ok, right_ok]).astype(jnp.float32).reshape(2, 1, h * w)


# -----------------------------------------------------------------------------
# Parameters (deterministic, mirrors Conv = conv(no bias) + BN + SiLU)
# -----------------------------------------------------------------------------
def _init_conv(key, c_in, c_out, k):
    kw, kg, kb, km, kv = jax.random.split(key, 5)
    fan_in = c_in * k * k
    return dict(
        w=jax.random.normal(kw, (c_out, c_in, k, k), jnp.float32)
          / jnp.sqrt(float(fan_in)),
        gamma=1.0 + 0.2 * jax.random.normal(kg, (c_out,), jnp.float32),
        beta=0.1 * jax.random.normal(kb, (c_out,), jnp.float32),
        mean=0.1 * jax.random.normal(km, (c_out,), jnp.float32),
        var=1.0 + 0.2 * jax.random.uniform(kv, (c_out,), jnp.float32),
    )


def init_c3_params(key, c1, c2, n=1, shortcut=True, e=0.5):
    c_ = int(c2 * e)
    keys = jax.random.split(key, 3 + 2 * n)
    return dict(
        cv1=_init_conv(keys[0], c1, c_, 1),
        cv2=_init_conv(keys[1], c1, c_, 1),
        cv3=_init_conv(keys[2], 2 * c_, c2, 1),
        m=[dict(cv1=_init_conv(keys[3 + 2 * i], c_, c_, 1),
                cv2=_init_conv(keys[4 + 2 * i], c_, c_, 3),
                add=bool(shortcut))                    # c_in == c_out here
          for i in range(n)],
    )


# -----------------------------------------------------------------------------
# C3 forward (Pallas) and pure-JAX reference
# -----------------------------------------------------------------------------
def c3_forward_pallas(x, params, io_dtype=jnp.bfloat16):
    n, c1, h, w = x.shape
    hw = h * w
    out_dtype = x.dtype
    xf = x.reshape(n, c1, hw).astype(io_dtype)

    # cv1 + cv2 fused: one HBM read of x, one stacked (2*c_, c1) MXU matmul.
    w1, b1 = _folded_1x1(params["cv1"])
    w2, b2 = _folded_1x1(params["cv2"])
    c_ = w1.shape[0]
    w12 = jnp.concatenate([w1, w2], axis=0).astype(io_dtype)
    b12 = jnp.concatenate([b1, b2], axis=0)
    y1, y2 = fused_pointwise([xf], [w12], b12, out_splits=(c_, c_))

    # Bottleneck chain: each block is a single fused kernel (no im2col, no
    # HBM round-trip of the 1x1 intermediate).
    cmask = _border_cmasks(h, w)
    cur = y1
    for blk in params["m"]:
        wb1, bb1 = _folded_1x1(blk["cv1"])
        wb2, bb2 = _folded_3x3_taps(blk["cv2"])
        cur = fused_bottleneck(cur, wb1.astype(io_dtype), bb1,
                               wb2.astype(io_dtype), bb2, cmask, h, w,
                               blk["add"])

    # cv3(cat([cur, y2], dim=1)): concat eliminated by splitting cv3's weight.
    w3, b3 = _folded_1x1(params["cv3"])
    out = fused_pointwise(
        [cur, y2],
        [w3[:, :c_].astype(io_dtype), w3[:, c_:].astype(io_dtype)],
        b3, out_dtype=out_dtype)
    return out.reshape(n, -1, h, w)


def _conv_bn_silu_ref(x, conv, k):
    pad = [(k // 2, k // 2)] * 2
    y = lax.conv_general_dilated(x, conv["w"], (1, 1), pad,
                                 dimension_numbers=("NCHW", "OIHW", "NCHW"),
                                 precision=lax.Precision.HIGHEST)
    inv = (1.0 / jnp.sqrt(conv["var"] + BN_EPS))[None, :, None, None]
    y = (y - conv["mean"][None, :, None, None]) * inv
    y = y * conv["gamma"][None, :, None, None] + conv["beta"][None, :, None, None]
    return y * jax.nn.sigmoid(y)


def c3_forward_ref(x, params):
    y1 = _conv_bn_silu_ref(x, params["cv1"], 1)
    y2 = _conv_bn_silu_ref(x, params["cv2"], 1)
    cur = y1
    for blk in params["m"]:
        t = _conv_bn_silu_ref(cur, blk["cv1"], 1)
        t = _conv_bn_silu_ref(t, blk["cv2"], 3)
        cur = cur + t if blk["add"] else t
    return _conv_bn_silu_ref(jnp.concatenate([cur, y2], axis=1),
                             params["cv3"], 1)


class C3:
    """Mirror of the PyTorch C3 module (inference path, folded BN)."""

    def __init__(self, c1, c2, n=1, shortcut=True, g=1, e=0.5, *, key,
                 io_dtype=jnp.bfloat16):
        assert g == 1, "grouped conv not implemented"
        self.params = init_c3_params(key, c1, c2, n, shortcut, e)
        self.io_dtype = io_dtype

    def __call__(self, x):
        return c3_forward_pallas(x, self.params, io_dtype=self.io_dtype)


if __name__ == "__main__":
    key = jax.random.PRNGKey(0)
    kx, kp = jax.random.split(key)

    c1, c2, n_rep = 16, 32, 1
    x = jax.random.normal(kx, (2, c1, 16, 16), dtype=jnp.float32)

    mod = C3(c1, c2, n=n_rep, shortcut=True, key=kp)          # bf16 fast path
    ref = jax.block_until_ready(c3_forward_ref(x, mod.params))

    # Strict correctness: f32 I/O path vs full-precision XLA reference.
    out_f32 = jax.block_until_ready(
        c3_forward_pallas(x, mod.params, io_dtype=jnp.float32))
    assert out_f32.shape == ref.shape == (2, c2, 16, 16), out_f32.shape
    assert out_f32.dtype == ref.dtype
    err32 = float(jnp.max(jnp.abs(out_f32 - ref)))
    assert bool(jnp.allclose(out_f32, ref, atol=2e-2, rtol=2e-2)), err32

    # Fast path: bf16 activations/weights in HBM, f32 accumulation on the MXU.
    out_bf16 = jax.block_until_ready(mod(x))
    assert out_bf16.shape == ref.shape and out_bf16.dtype == ref.dtype
    err16 = float(jnp.max(jnp.abs(out_bf16 - ref)))
    assert bool(jnp.allclose(out_bf16, ref, atol=1e-1, rtol=1e-1)), err16

    print("KERNEL_OK")
</pallas_src>

<mosaic_0001>
module attributes {stable_mosaic.version = 11 : i64} {
  func.func @kernel(%arg0: i32, %arg1: i32, %arg2: memref<1x16x256xf32, #tpu.memory_space<vmem>>, %arg3: memref<32x16xf32, #tpu.memory_space<vmem>>, %arg4: memref<32x1xf32, #tpu.memory_space<vmem>>, %arg5: memref<1x16x256xf32, #tpu.memory_space<vmem>>, %arg6: memref<1x16x256xf32, #tpu.memory_space<vmem>>) attributes {dimension_semantics = [#tpu.dimension_semantics<parallel>, #tpu.dimension_semantics<parallel>], iteration_bounds = array<i64: 2, 1>, scalar_prefetch = 0 : i64, scratch_operands = 0 : i64, tpu.core_type = #tpu.core_type<tc>, window_params = [{transform_indices = @transform_0, window_bounds = array<i64: 1, 16, 256>}, {pipeline_mode = #tpu.pipeline_mode<synchronous>, transform_indices = @transform_1, window_bounds = array<i64: 32, 16>}, {pipeline_mode = #tpu.pipeline_mode<synchronous>, transform_indices = @transform_2, window_bounds = array<i64: 32, 1>}, {transform_indices = @transform_3, window_bounds = array<i64: 1, 16, 256>}, {transform_indices = @transform_4, window_bounds = array<i64: 1, 16, 256>}]} {
    %c0 = arith.constant 0 : index
    %c0_0 = arith.constant 0 : index
    %0 = vector.load %arg4[%c0, %c0_0] : memref<32x1xf32, #tpu.memory_space<vmem>>, vector<32x1xf32>
    %c0_1 = arith.constant 0 : index
    %c0_2 = arith.constant 0 : index
    %1 = vector.load %arg3[%c0_1, %c0_2] : memref<32x16xf32, #tpu.memory_space<vmem>>, vector<32x16xf32>
    %c0_3 = arith.constant 0 : index
    %c0_4 = arith.constant 0 : index
    %c0_5 = arith.constant 0 : index
    %2 = vector.load %arg2[%c0_3, %c0_4, %c0_5] : memref<1x16x256xf32, #tpu.memory_space<vmem>>, vector<1x16x256xf32>
    %3 = vector.shape_cast %2 : vector<1x16x256xf32> to vector<16x256xf32>
    %cst = arith.constant dense<0.000000e+00> : vector<32x256xf32>
    %4 = tpu.matmul %1, %3, %cst {dimension_numbers = #tpu.dot_dimension_numbers<[1], [0], [0], [1], [0, 0, 1, 1], [], []>} : vector<32x16xf32>, vector<16x256xf32>, vector<32x256xf32> -> vector<32x256xf32>
    %5 = vector.broadcast %0 : vector<32x1xf32> to vector<32x256xf32>
    %6 = arith.addf %5, %4 : vector<32x256xf32>
    %cst_6 = arith.constant 0.000000e+00 : f32
    %7 = vector.broadcast %cst_6 : f32 to vector<32x256xf32>
    %8 = arith.subf %7, %6 : vector<32x256xf32>
    %9 = math.exp %8 : vector<32x256xf32>
    %cst_7 = arith.constant 1.000000e+00 : f32
    %10 = vector.broadcast %cst_7 : f32 to vector<32x256xf32>
    %11 = arith.addf %10, %9 : vector<32x256xf32>
    %12 = tpu.reciprocal %11 {approx = true} : vector<32x256xf32> -> vector<32x256xf32>
    %13 = arith.mulf %6, %12 : vector<32x256xf32>
    %14 = vector.extract_strided_slice %13 {offsets = [0, 0], sizes = [16, 256], strides = [1, 1]} : vector<32x256xf32> to vector<16x256xf32>
    %c0_8 = arith.constant 0 : index
    %c0_9 = arith.constant 0 : index
    %c0_10 = arith.constant 0 : index
    %15 = vector.load %arg5[%c0_8, %c0_9, %c0_10] : memref<1x16x256xf32, #tpu.memory_space<vmem>>, vector<1x16x256xf32>
    %16 = vector.shape_cast %15 : vector<1x16x256xf32> to vector<16x256xf32>
    %17 = vector.shape_cast %14 : vector<16x256xf32> to vector<1x16x256xf32>
    tpu.vector_store %arg5[%c0_8, %c0_9, %c0_10], %17 {strides = array<i32>} : memref<1x16x256xf32, #tpu.memory_space<vmem>>, vector<1x16x256xf32>,
    %18 = vector.extract_strided_slice %13 {offsets = [16, 0], sizes = [16, 256], strides = [1, 1]} : vector<32x256xf32> to vector<16x256xf32>
    %c0_11 = arith.constant 0 : index
    %c0_12 = arith.constant 0 : index
    %c0_13 = arith.constant 0 : index
    %19 = vector.load %arg6[%c0_11, %c0_12, %c0_13] : memref<1x16x256xf32, #tpu.memory_space<vmem>>, vector<1x16x256xf32>
    %20 = vector.shape_cast %19 : vector<1x16x256xf32> to vector<16x256xf32>
    %21 = vector.shape_cast %18 : vector<16x256xf32> to vector<1x16x256xf32>
    tpu.vector_store %arg6[%c0_11, %c0_12, %c0_13], %21 {strides = array<i32>} : memref<1x16x256xf32, #tpu.memory_space<vmem>>, vector<1x16x256xf32>,
    return
  }
  func.func @transform_0(%arg0: i32, %arg1: i32) -> (i32, i32, i32) {
    %c0_i32 = arith.constant 0 : i32
    %c0_i32_0 = arith.constant 0 : i32
    return %arg0, %c0_i32, %arg1 : i32, i32, i32
  }
  func.func @transform_1(%arg0: i32, %arg1: i32) -> (i32, i32) {
    %c0_i32 = arith.constant 0 : i32
    %c0_i32_0 = arith.constant 0 : i32
    %c0_i32_1 = arith.constant 0 : i32
    return %c0_i32, %c0_i32_0 : i32, i32
  }
  func.func @transform_2(%arg0: i32, %arg1: i32) -> (i32, i32) {
    %c0_i32 = arith.constant 0 : i32
    %c0_i32_0 = arith.constant 0 : i32
    %c0_i32_1 = arith.constant 0 : i32
    return %c0_i32, %c0_i32_0 : i32, i32
  }
  func.func @transform_3(%arg0: i32, %arg1: i32) -> (i32, i32, i32) {
    %c0_i32 = arith.constant 0 : i32
    %c0_i32_0 = arith.constant 0 : i32
    return %arg0, %c0_i32, %arg1 : i32, i32, i32
  }
  func.func @transform_4(%arg0: i32, %arg1: i32) -> (i32, i32, i32) {
    %c0_i32 = arith.constant 0 : i32
    %c0_i32_0 = arith.constant 0 : i32
    return %arg0, %c0_i32, %arg1 : i32, i32, i32
  }
}

</mosaic_0001>

<bundles_post_ra>
// kernel: tpu_custom_call.1
= control target key start
LH: loop header
LB: loop body
LE: loop exit
PB: predicated region body
PF: predicated region fallthrough
CT: control target
= control target key end

     0   :  { %10 = vsyncpa [#allocation3], 0  ;;  %s1074_s0 = inlined_call_operand.vmem [shape: f32[2,16,256], index: 0, kind: input, shape index: {}]   ;;  %s1075_s1 = inlined_call_operand.vmem [shape: f32[32,16], index: 1, kind: input, shape index: {}]   ;;  %s1076_s2 = inlined_call_operand.vmem [shape: f32[32,1], index: 2, kind: input, shape index: {}]   ;;  %s1077_s3 = inlined_call_operand.hbm [shape: f32[2,16,256], index: 3, kind: output, shape index: {0}]   ;;  %s1078_s4 = inlined_call_operand.hbm [shape: f32[2,16,256], index: 4, kind: output, shape index: {1}]  }
   0x1   :  { %12 = vsyncpa [#allocation3 + $0x1], 0 }
   0x2   :  { %13 = vsyncpa [#allocation5], 0 }
   0x3   :  { %15 = vsyncpa [#allocation5 + $0x1], 0  ;;  %s863_s15 = smov 0   ;;  %s865_s16 = smov 0  }
   0x4   :  { %s867_s17 = smov 0   ;;  %s869_s18 = smov 0  }
   0x5   :  { %s871_s19 = smov 0   ;;  %s873_s20 = smov 0  }
   0x6 LB: > { %s592_s21 = sadd.s32 4294967295, %s830_s20   ;;  %s593_s22 = sadd.s32 4294967294, %s830_s20   ;;  %s830_s20 = sphi %s873_s20, %s21_s20   ;;  %s826_s19 = sphi %s871_s19, %s1085_s19   ;;  %s822_s18 = sphi %s869_s18, %s1084_s18   ;;  %s818_s17 = sphi %s867_s17, %s1083_s17   ;;  %s814_s16 = sphi %s865_s16, %s1082_s16   ;;  %s810_s15 = sphi %s863_s15, %s1081_s15  }
   0x7   : > { %s33_s23 = sadd.s32 1, %s826_s19  ;;  %s112_s24 = sadd.s32 1, %s818_s17 }
   0x8   : > { %p35_p0 = scmp.ge.s32.totalorder %s33_s23, 2  ;;  %p122_p1 = scmp.ne.s32.totalorder %s818_s17, %s814_s16 }
   0x9   : > { %p123_p2 = scmp.eq.s32.totalorder %s592_s21, 1  ;;  %p128_p3 = scmp.ne.s32.totalorder %s814_s16, %s810_s15 }
   0xa   : > { %s1087_s23 = smov (%p35_p0, %s33_s23), 0  ;;  %p129_p5 = scmp.eq.s32.totalorder %s593_s22, 1 }
   0xb   : > { %p903_p4 = por %p123_p2, %p122_p1  ;;  %s107_s26 = ssub.s32 %s826_s19, %s1087_s23 }
   0xc   : > { %p596_p6 = scmp.ge.s32.totalorder %s830_s20, 1  ;;  %p110_p7 = scmp.eq.s32.totalorder %s107_s26, 0 }
   0xd   : > { %p910_p8 = por %p129_p5, %p128_p3  ;;  %p194_p9 = scmp.lt.s32.totalorder %s830_s20, 3 }
   0xe   : > { %s916_s28 = scalar_select %p110_p7, %s818_s17, %s112_s24  }
   0xf   : > { %p195_p10 = pnand %p596_p6, %p194_p9 }
  0x10   : > { %p230_p11 = scmp.lt.s32.totalorder (!%p195_p10), %s822_s18, 1  ;;  %v832_v0 = vmov (!%p195_p10), 0.0   ;;  %v243_v1 = vld [vmem:[%s1076_s2 + $0x10] sm:$0xff] (!%p195_p10)  ;;  %v241_v2 = vld [vmem:[%s1076_s2] sm:$0xff] (!%p195_p10)  ;;  %v833_v3 = vmov (!%p195_p10), 0   ;;  %v244_v4 = vld [vmem:[%s1076_s2 + $0x18] sm:$0xff] (!%p195_p10) }
  0x11   : > { %198 = sbr.rel (%p195_p10) target bundleno = 324 (0x144), region = 32  ;;  %330 = vmatprep.mubr.f32.mxu0 (!%p195_p10), %v832_v0  ;;  %342 = vmatprep.mubr.f32.mxu1 (!%p195_p10), %v832_v0  ;;  %v242_v5 = vld [vmem:[%s1076_s2 + $0x8] sm:$0xff] (!%p195_p10)  ;;  %v245_v12 = vld [vmem:[%s1075_s1] sm:$0xff] (!%p195_p10)  ;;  %vm253_vm0 = vcmask (!%p195_p10), 130048   ;;  %v247_v13 = vld [vmem:[%s1075_s1 + $0x10] sm:$0xff] (!%p195_p10)  ;;  %s614_s12 = sshll.u32 (!%p195_p10), %s822_s18, 9 }
  0x12   : > { %687 = vset.pattern.permute.xlu1 (!%p195_p10), %v833_v3  ;;  %686 = vset.pattern.permute.xlu0 (!%p195_p10), %v833_v3  ;;  %v246_v14 = vld [vmem:[%s1075_s1 + $0x8] sm:$0xff] (!%p195_p10)  ;;  %v248_v15 = vld [vmem:[%s1075_s1 + $0x18] sm:$0xff] (!%p195_p10)  ;;  %s987_s22 = scalar_lea.hbm (!%p195_p10), %s1077_s3, %s614_s12  ;;  %s996_s29 = scalar_lea.hbm (!%p195_p10), %s1078_s4, %s614_s12 }
  0x13   : > { %367 = vperm.xlu1 (!%p195_p10), %687, %v243_v1   ;;  %357 = vperm.xlu0 (!%p195_p10), %686, %v241_v2   ;;  %s834_s6 = smov (!%p195_p10), [#allocation2]  }
  0x17   : > { %372 = vperm.xlu1 (!%p195_p10), %687, %v244_v4   ;;  %362 = vperm.xlu0 (!%p195_p10), %686, %v242_v5  }
  0x18   : > { %s231_s7 = scalar_select %p230_p11, %s822_s18, 1 }
  0x1a   : > { %s613_s8 = sshll.u32 %s231_s7, 5  ;;  %s724_s7 = sshll.u32 %s834_s6, 4  ;;  %s725_s7 = int_to_ptr.vmem [resolvable:$false] %s724_s7 }
  0x1b   : > { %s237_s21 = scalar_lea.vmem %s1074_s0, %s613_s8  ;;  %s972_s8 = sand.u32 1, %s814_s16  }
  0x1c   : > { %v250_v6 = vld [vmem:[%s237_s21 + $0x8] sm:$0xff]  ;;  %v252_v7 = vld [vmem:[%s237_s21 + $0x18] sm:$0xff]  ;;  %v249_v8 = vld [vmem:[%s237_s21] sm:$0xff]  ;;  %s597_s9 = sshll.u32 %s972_s8, 5  ;;  %s440_s30 = scalar_lea.sflag [#allocation3], %s972_s8 }
  0x1d   : > { %v616_v9 = vpack.c.bf16 %v252_v7, %v250_v6  ;;  %v251_v10 = vld [vmem:[%s237_s21 + $0x10] sm:$0xff]  ;;  %s221_s10 = scalar_lea.vmem [#allocation2], %s597_s9  ;;  %s228_s13 = scalar_lea.vmem [#allocation4], %s597_s9 }
  0x1e   : > { %v618_v11 = vpack.c.bf16 %v251_v10, %v249_v8  ;;  %s460_s11 = sshll.u32 %s221_s10, 4  ;;  %s478_s14 = sshll.u32 %s228_s13, 4  ;;  %s981_s11 = int_to_ptr.vmem [resolvable:$true] %s460_s11  ;;  %s990_s14 = int_to_ptr.vmem [resolvable:$true] %s478_s14 }
  0x1f   : > { %617 = vmatprep.subr.bf16.mxu0 %v616_v9  ;;  %620 = vmatprep.subr.bf16.mxu1 %v616_v9  ;;  %s720_s5 = scalar_lea.vmem %s981_s11, 512  ;;  %s726_s9 = scalar_lea.vmem %s725_s7, 1024 }
  0x20   : > { %619 = vmatpush1.bf16.msra.mxu0 %v618_v11  ;;  %621 = vmatpush1.bf16.msra.mxu1 %v618_v11  ;;  %p721_p12 = scmp.ne.s32.totalorder %s981_s11, %s720_s5  ;;  %p727_p1 = scmp.lt.s32.totalorder %s981_s11, %s725_s7 }
  0x21   : > { %p728_p2 = scmp.lt.s32.totalorder %s726_s9, %s720_s5 }
  0x22   : > { %p722_p13 = pnand %p721_p12, %p903_p4 }
  0x23   : > { %601 = vmatmul.mubr.msk.f32.vlgmr.msra.gmra.mrb[0].mxu0 %vm253_vm0, %v245_v12  ;;  %603 = vmatmul.mubr.msk.f32.vlgmr.msra.gmra.mrb[0].mxu1 %vm253_vm0, %v247_v13  ;;  %p729_p3 = por %p728_p2, %p727_p1 }
  0x24   : > { %336 = vmatprep.mubr.f32.mxu0 %v832_v0  ;;  %348 = vmatprep.mubr.f32.mxu1 %v832_v0  ;;  %p723_p0 = pneg %p722_p13 }
  0x26   : > { %p730_p5 = pnand %p729_p3, %p723_p0 }
  0x27   : > { %602 = vmatmul.mubr.msk.f32.gmra.mrb[2].mxu0 %vm253_vm0, %v246_v14  ;;  %604 = vmatmul.mubr.msk.f32.gmra.mrb[2].mxu1 %vm253_vm0, %v248_v15 }
  0x92   : > { %v368_v16 = vpop.permute.xlu1 %367  ;;  %v358_v17 = vpop.permute.xlu0 %357 }
  0x96   : > { %v373_v28 = vpop.permute.xlu1 %372  ;;  %v363_v29 = vpop.permute.xlu0 %362 }
  0xf6   : > { %v332_v18 = vpop.f32.mrb[0].mxu0  ;;  %v344_v19 = vpop.f32.mrb[0].mxu1 }
  0xf7   : > { %v947_v20 = vadd.f32 %v358_v17, %v332_v18  ;;  %v949_v21 = vadd.f32 %v368_v16, %v344_v19  ;;  %v334_v22 = vpop.f32.mrb[1].mxu0  ;;  %v346_v23 = vpop.f32.mrb[1].mxu1 }
  0xf8   : > { %v951_v24 = vadd.f32 %v358_v17, %v334_v22  ;;  %v953_v25 = vadd.f32 %v368_v16, %v346_v23 }
  0xf9   : > { %v383_v26 = vsub.f32 0.0, %v947_v20  ;;  %v387_v27 = vsub.f32 0.0, %v949_v21 }
  0xfa   : > { %v384_v30 = vsub.f32 0.0, %v951_v24  ;;  %v388_v31 = vsub.f32 0.0, %v953_v25  ;;  %v338_v32 = vpop.f32.mrb[2].mxu0  ;;  %v350_v33 = vpop.f32.mrb[2].mxu1 }
  0xfb   : > { %v391_v34 = vmul.f32 1.442695, %v383_v26  ;;  %v399_v35 = vmul.f32 1.442695, %v387_v27  ;;  %v959_v36 = vadd.f32 %v363_v29, %v338_v32  ;;  %v961_v37 = vadd.f32 %v373_v28, %v350_v33  ;;  %v340_v38 = vpop.f32.mrb[3].mxu0  ;;  %v352_v39 = vpop.f32.mrb[3].mxu1 }
  0xfc   : > { %v393_v40 = vmul.f32 1.442695, %v384_v30  ;;  %v401_v41 = vmul.f32 1.442695, %v388_v31  ;;  %v963_v42 = vadd.f32 %v363_v29, %v340_v38  ;;  %v965_v43 = vadd.f32 %v373_v28, %v352_v39 }
  0xfd   : > { %688 = vpow2.f32 %v391_v34  ;;  %v385_v44 = vsub.f32 0.0, %v959_v36  ;;  %v389_v45 = vsub.f32 0.0, %v961_v37 }
  0xfe   : > { %690 = vpow2.f32 %v399_v35  ;;  %v386_v46 = vsub.f32 0.0, %v963_v42  ;;  %v390_v47 = vsub.f32 0.0, %v965_v43 }
  0xff   : > { %692 = vpow2.f32 %v393_v40  ;;  %v395_v48 = vmul.f32 1.442695, %v385_v44  ;;  %v403_v49 = vmul.f32 1.442695, %v389_v45 }
 0x100   : > { %694 = vpow2.f32 %v401_v41  ;;  %v397_v50 = vmul.f32 1.442695, %v386_v46  ;;  %v405_v51 = vmul.f32 1.442695, %v390_v47 }
 0x101   : > { %696 = vpow2.f32 %v395_v48 }
 0x102   : > { %698 = vpow2.f32 %v403_v49 }
 0x103   : > { %700 = vpow2.f32 %v397_v50 }
 0x104   : > { %702 = vpow2.f32 %v405_v51 }
 0x107   : > { %v689_v52 = vpop.eup %688 }
 0x108   : > { %v691_v53 = vpop.eup %690  ;;  %v407_v54 = vadd.f32 1.0, %v689_v52 }
 0x109   : > { %v693_v55 = vpop.eup %692  ;;  %v411_v56 = vadd.f32 1.0, %v691_v53 }
 0x10a   : > { %v695_v57 = vpop.eup %694  ;;  %704 = vrcp.f32 %v407_v54  ;;  %v408_v58 = vadd.f32 1.0, %v693_v55 }
 0x10b   : > { %v697_v59 = vpop.eup %696  ;;  %706 = vrcp.f32 %v411_v56  ;;  %v412_v60 = vadd.f32 1.0, %v695_v57 }
 0x10c   : > { %v699_v61 = vpop.eup %698  ;;  %708 = vrcp.f32 %v408_v58  ;;  %v409_v62 = vadd.f32 1.0, %v697_v59 }
 0x10d   : > { %v701_v63 = vpop.eup %700  ;;  %710 = vrcp.f32 %v412_v60  ;;  %v413_v0 = vadd.f32 1.0, %v699_v61 }
 0x10e   : > { %v703_v1 = vpop.eup %702  ;;  %712 = vrcp.f32 %v409_v62  ;;  %v410_v2 = vadd.f32 1.0, %v701_v63 }
 0x10f   : > { %714 = vrcp.f32 %v413_v0  ;;  %v414_v3 = vadd.f32 1.0, %v703_v1 }
 0x110   : > { %716 = vrcp.f32 %v410_v2 }
 0x111   : > { %718 = vrcp.f32 %v414_v3 }
 0x114   : > { %v705_v4 = vpop.eup %704 }
 0x115   : > { %v707_v5 = vpop.eup %706  ;;  %v423_v6 = vmul.f32 %v705_v4, %v947_v20 }
 0x116   : > { %v709_v7 = vpop.eup %708  ;;  %v427_v8 = vmul.f32 %v707_v5, %v949_v21 }
 0x117   : > { %v711_v9 = vpop.eup %710  ;;  %431 = vst [vmem:[%s221_s10] sm:$0xff] %v423_v6  ;;  %v424_v10 = vmul.f32 %v709_v7, %v951_v24 }
 0x118   : > { %v713_v11 = vpop.eup %712  ;;  %435 = vst [vmem:[%s228_s13] sm:$0xff] %v427_v8  ;;  %v428_v12 = vmul.f32 %v711_v9, %v953_v25 }
 0x119   : > { %v715_v13 = vpop.eup %714  ;;  %432 = vst [vmem:[%s221_s10 + $0x8] sm:$0xff] %v424_v10  ;;  %v425_v14 = vmul.f32 %v713_v11, %v959_v36 }
 0x11a   : > { %v717_v15 = vpop.eup %716  ;;  %436 = vst [vmem:[%s228_s13 + $0x8] sm:$0xff] %v428_v12  ;;  %v429_v16 = vmul.f32 %v715_v13, %v961_v37 }
 0x11b   : > { %v719_v17 = vpop.eup %718  ;;  %433 = vst [vmem:[%s221_s10 + $0x10] sm:$0xff] %v425_v14  ;;  %v426_v18 = vmul.f32 %v717_v15, %v963_v42 }
 0x11c   : > { %437 = vst [vmem:[%s228_s13 + $0x10] sm:$0xff] %v429_v16  ;;  %v430_v19 = vmul.f32 %v719_v17, %v965_v43 }
 0x11d   : > { %434 = vst [vmem:[%s221_s10 + $0x18] sm:$0xff] %v426_v18 }
 0x11e   : > { %438 = vst [vmem:[%s228_s13 + $0x18] sm:$0xff] %v430_v19 }
 0x11f   : > { %733 = shalt.err (!%p730_p5)
}
 0x120   : > { %s734_s10 = scalar_lea.hbm %s987_s22, 512  ;;  %s738_s18 = scalar_lea.hbm %s1077_s3, 1024 }
 0x121   : > { %p735_p6 = scmp.ne.s32.totalorder %s987_s22, %s734_s10  ;;  %p739_p10 = scmp.lt.u32.totalorder %s987_s22, %s1077_s3 }
 0x122   : > { %p740_p11 = scmp.lt.u32.totalorder %s738_s18, %s734_s10  ;;  %p742_p13 = scmp.lt.u32.totalorder %s734_s10, %s987_s22 }
 0x123   : > { %p736_p7 = pnand %p735_p6, %p903_p4 }
 0x124   : > { %p741_p12 = por %p740_p11, %p739_p10 }
 0x125   : > { %p737_p9 = pneg %p736_p7 }
 0x126   : > { %p743_p0 = por %p742_p13, %p741_p12 }
 0x128   : > { %p744_p1 = pnand %p743_p0, %p737_p9 }
 0x12a   : > { %747 = shalt.err (!%p744_p1)
}
 0x12b   : > { %s835_s26 = smov 256   ;;  %s836_s5 = smov 16  }
 0x12c   : > { %622 = dma.vmem_to_hbm [thread:$0]  (%p903_p4), %s981_s11, 512, %s987_s22, %s440_s30, %s835_s26, %s835_s26, %s836_s5  }
 0x12d   : > { %s445_s6 = scalar_lea.sflag [#allocation5], %s972_s8  ;;  %s748_s7 = scalar_lea.vmem %s990_s14, 512 }
 0x12e   : > { %p749_p2 = scmp.ne.s32.totalorder %s990_s14, %s748_s7  ;;  %s837_s9 = smov [#allocation4]  }
 0x12f   : > { %s752_s10 = sshll.u32 %s837_s9, 4  ;;  %s753_s10 = int_to_ptr.vmem [resolvable:$false] %s752_s10 }
 0x130   : > { %p750_p3 = pnand %p749_p2, %p903_p4  ;;  %s754_s12 = scalar_lea.vmem %s753_s10, 1024 }
 0x131   : > { %p755_p6 = scmp.lt.s32.totalorder %s990_s14, %s753_s10  ;;  %p756_p7 = scmp.lt.s32.totalorder %s754_s12, %s748_s7 }
 0x132   : > { %p751_p5 = pneg %p750_p3 }
 0x133   : > { %p757_p9 = por %p756_p7, %p755_p6 }
 0x135   : > { %p758_p10 = pnand %p757_p9, %p751_p5 }
 0x137   : > { %761 = shalt.err (!%p758_p10)
}
 0x138   : > { %s762_s11 = scalar_lea.hbm %s996_s29, 512  ;;  %s766_s13 = scalar_lea.hbm %s1078_s4, 1024 }
 0x139   : > { %p763_p11 = scmp.ne.s32.totalorder %s996_s29, %s762_s11  ;;  %p767_p0 = scmp.lt.u32.totalorder %s996_s29, %s1078_s4 }
 0x13a   : > { %p768_p1 = scmp.lt.u32.totalorder %s766_s13, %s762_s11  ;;  %p770_p3 = scmp.lt.u32.totalorder %s762_s11, %s996_s29 }
 0x13b   : > { %p764_p12 = pnand %p763_p11, %p903_p4 }
 0x13c   : > { %p769_p2 = por %p768_p1, %p767_p0 }
 0x13d   : > { %p765_p13 = pneg %p764_p12 }
 0x13e   : > { %p771_p5 = por %p770_p3, %p769_p2 }
 0x140   : > { %p772_p6 = pnand %p771_p5, %p765_p13 }
 0x142   : > { %775 = shalt.err (!%p772_p6)
}
 0x143   : > { %623 = dma.vmem_to_hbm [thread:$0]  (%p903_p4), %s990_s14, 512, %s996_s29, %s445_s6, %s835_s26, %s835_s26, %s836_s5  }
 0x144 PF: > { %p633_p7 = scmp.ge.s32.totalorder %s830_s20, 2  ;;  %s493_s24 = sand.u32 1, %s810_s15  }
 0x145   : > { %s494_s7 = scalar_lea.sflag [#allocation3], %s493_s24 }
 0x146   : > { %p627_p9 = pnand %p633_p7, %p910_p8 }
 0x148   : > { %801 = dma.done.wait (!%p627_p9), %s494_s7, 512  }
 0x149   : > { %803 = vsyncadd (!%p627_p9), %s494_s7, 4294966784  ;;  %s503_s25 = scalar_lea.sflag [#allocation5], %s493_s24 }
 0x14a   : > { %805 = dma.done.wait (!%p627_p9), %s503_s25, 512  }
 0x14b   : > { %807 = vsyncadd (!%p627_p9), %s503_s25, 4294966784  ;;  %s21_s20 = sadd.s32 1, %s830_s20   ;;  %s1081_s15 = smov %s814_s16 }
 0x14c   : > { %p18_p10 = scmp.ge.s32.totalorder %s21_s20, 4   ;;  %s1082_s16 = smov %s818_s17 }
 0x14d   : > { %s1083_s17 = smov %s916_s28  ;;  %s1084_s18 = smov %s826_s19 }
 0x14e   : > { %s1085_s19 = smov %s1087_s23  ;;  %20 = sbr.rel (!%p18_p10) target bundleno = 6 (0x6), region = 84 }
 0x155   :  { %508 = vsyncpa [#allocation3], 1 }
 0x156   :  { %510 = vsyncpa [#allocation3 + $0x1], 1 }
 0x157   :  { %511 = vsyncpa [#allocation5], 1 }
 0x158   :  { %513 = vsyncpa [#allocation5 + $0x1], 1 }

</bundles_post_ra>
